<compile_context>
chip_gen: v7x
topology: tpu7x:2x2x1
jax: 0.10.0
libtpu: 0.0.40
codegen_flags: <defaults>
</compile_context>

<pallas_src>
import functools
import math

import numpy as np

import jax
import jax.numpy as jnp
from jax.experimental import pallas as pl
from jax.experimental.pallas import tpu as pltpu


def _round_up(x, m):
    return -(-x // m) * m


def _rope_cache_kernel(coef_ref, cos_ref, sin_ref, *, pack, half, dim,
                       row_tile, half_compute):
    """Fill one (row_tile, lanes) tile of the packed cos/sin cache.

    coef_ref (2, CL) f32, resident in VMEM for the whole grid:
      row 0: inv_freq_lane[c]  (exact host-computed 1/base**(2j/dim))
      row 1: pos_off[c] = c // dim   (only used on the packed / padded path)

    Packed layout (half_compute == False): packed row r, lane c correspond to
    position s = r*pack + c//dim, channel d = c % dim, j = d % half, so
      emb[s, d] = s * inv_freq[j]        (i.e. cat(freqs, freqs)).
    Half-compute layout (dim % 256 == 0): compute on (row_tile, half) and
    duplicate via two direct full-width stores.
    """
    i = pl.program_id(0)
    cl = coef_ref.shape[1]
    inv_freq = coef_ref[0:1, :]                       # (1, CL) f32

    row = jax.lax.broadcasted_iota(jnp.int32, (row_tile, cl), 0)
    rp = row + i * row_tile
    if pack != 1:
        rp = rp * pack
    base_pos = rp.astype(jnp.float32)                 # exact (< 2^24)

    if half_compute:
        arg = base_pos * inv_freq                     # (row_tile, half)
        cos_vals = jnp.cos(arg).astype(cos_ref.dtype)
        sin_vals = jnp.sin(arg).astype(sin_ref.dtype)
        # Duplicate cat(freqs, freqs) with two direct full-width stores
        # (half is a multiple of 128 -> unmasked vst's, no temporary concat).
        cos_ref[:, 0:half] = cos_vals
        cos_ref[:, half:dim] = cos_vals
        sin_ref[:, 0:half] = sin_vals
        sin_ref[:, half:dim] = sin_vals
    else:
        pos_off = coef_ref[1:2, :]                    # (1, CL) f32
        arg = (base_pos + pos_off) * inv_freq         # (row_tile, lanes)
        cos_ref[...] = jnp.cos(arg).astype(cos_ref.dtype)
        sin_ref[...] = jnp.sin(arg).astype(sin_ref.dtype)


def build_rope_cache(dim, max_seq, base=10000.0, dtype=jnp.float32):
    """Builds (cos_cached, sin_cached), each (max_seq, dim), via one Pallas call."""
    assert dim % 2 == 0, "rotary dim must be even"
    half = dim // 2

    lanes_lcm = math.lcm(dim, 128)
    if half % 128 == 0:
        # dim % 256 == 0: half the transcendental work, duplicate via stores.
        pack, lanes = 1, dim
        compute_lanes, half_compute = half, True
    elif lanes_lcm <= 1024:
        # Lane-dense packing: pack = lanes/dim positions per output row
        # (pack is always a power of two since gcd(dim, 128) is).
        pack, lanes = lanes_lcm // dim, lanes_lcm
        compute_lanes, half_compute = lanes_lcm, False
    else:
        # Awkward dim: pad the lane axis to a multiple of 128 and trim later.
        pack, lanes = 1, _round_up(dim, 128)
        compute_lanes, half_compute = _round_up(dim, 128), False

    itemsize = jnp.dtype(dtype).itemsize
    sublane = max(8, 32 // itemsize)            # 8 rows for f32, 16 for bf16
    rows = -(-max_seq // pack)                  # packed rows needed (ceil)

    # Tile sizing: ~2 MiB f32-equivalent per output block (amortizes the
    # ~0.35us per-step overhead; 2 outputs x 2 buffers + f32 intermediates
    # stay under every generation's scoped-VMEM default, incl. v5e's 16 MiB
    # and v7x's 64 MiB physical VMEM).  Target >= 2 grid steps (not 8) so
    # both v7x TensorCores get tiles; on single-TC v5e/v6e the extra step
    # boundary is negligible.
    row_cap = max(sublane, ((2 << 20) // (lanes * 4)) // sublane * sublane)
    row_tile = min(row_cap, max(sublane, _round_up(-(-rows // 2), sublane)))
    rows_padded = _round_up(rows, row_tile)
    grid = (rows_padded // row_tile,)

    # Host-side EXACT column-invariant coefficients (hoisted out of the
    # kernel): per-lane inv_freq and per-lane position offset.
    inv_freq = 1.0 / (np.float32(base) ** (
        np.arange(0, dim, 2, dtype=np.float32) / np.float32(dim)))
    inv_freq = inv_freq.astype(np.float32)                       # (half,)
    if half_compute:
        invf_lane = inv_freq                                     # (half,)
        pos_off = np.zeros((compute_lanes,), np.float32)
    else:
        c = np.arange(compute_lanes)
        invf_lane = inv_freq[(c % dim) % half]
        pos_off = (c // dim).astype(np.float32)
    coefs = jnp.asarray(np.stack([invf_lane, pos_off]).astype(np.float32))

    kernel = functools.partial(_rope_cache_kernel, pack=pack, half=half,
                               dim=dim, row_tile=row_tile,
                               half_compute=half_compute)
    cos2d, sin2d = pl.pallas_call(
        kernel,
        out_shape=(jax.ShapeDtypeStruct((rows_padded, lanes), dtype),
                   jax.ShapeDtypeStruct((rows_padded, lanes), dtype)),
        grid_spec=pltpu.PrefetchScalarGridSpec(
            num_scalar_prefetch=0,
            grid=grid,
            # Tiny resident input: constant block index -> loaded once.
            in_specs=[pl.BlockSpec((2, compute_lanes), lambda i: (0, 0))],
            out_specs=[pl.BlockSpec((row_tile, lanes), lambda i: (i, 0)),
                       pl.BlockSpec((row_tile, lanes), lambda i: (i, 0))],
        ),
        compiler_params=pltpu.CompilerParams(
            dimension_semantics=("parallel",),
            vmem_limit_bytes=32 << 20),
    )(coefs)

    if pack > 1:
        # Row-major unpack (trivial reshape) + trim padded tail rows.
        cos = cos2d.reshape(rows_padded * pack, dim)[:max_seq]
        sin = sin2d.reshape(rows_padded * pack, dim)[:max_seq]
    else:
        # Trim padded rows and (if dim was lane-padded) padded lanes.
        cos = cos2d[:max_seq, :dim]
        sin = sin2d[:max_seq, :dim]
    return cos, sin


class AdapterRotaryEmbedding:
    """JAX/Pallas port of the PyTorch AdapterRotaryEmbedding module."""

    def __init__(self, dim, max_position_embeddings=2048, base=10000,
                 dtype=jnp.float32):
        self.dim = dim
        self.max_position_embeddings = max_position_embeddings
        self.base = float(base)
        self._set_cos_sin_cache(max_position_embeddings, dtype)

    def _set_cos_sin_cache(self, seq_len, dtype):
        cos, sin = build_rope_cache(self.dim, seq_len, base=self.base,
                                    dtype=dtype)
        self.max_seq_len_cached = seq_len
        self._cache_dtype = jnp.dtype(dtype)
        self.cos_cached = cos
        self.sin_cached = sin
        # Memoized per-dtype casts so alternating dtypes do not thrash
        # full kernel rebuilds.
        self._variants = {self._cache_dtype: (cos, sin)}

    def __call__(self, x, seq_len=None):
        if seq_len is None:
            seq_len = self.max_seq_len_cached
        if seq_len > self.max_seq_len_cached:
            self._set_cos_sin_cache(seq_len, x.dtype)
        dt = jnp.dtype(x.dtype)
        if dt not in self._variants:
            self._variants[dt] = (self.cos_cached.astype(dt),
                                  self.sin_cached.astype(dt))
        cos, sin = self._variants[dt]
        return cos[:seq_len], sin[:seq_len]


def _reference(dim, max_seq, seq_len, base=10000.0):
    inv_freq = 1.0 / (base ** (jnp.arange(0, dim, 2, dtype=jnp.float32) / dim))
    t = jnp.arange(max_seq, dtype=jnp.float32)
    freqs = jnp.outer(t, inv_freq)
    emb = jnp.concatenate([freqs, freqs], axis=-1)
    return jnp.cos(emb)[:seq_len], jnp.sin(emb)[:seq_len]


if __name__ == "__main__":
    key = jax.random.PRNGKey(0)
    batch, num_heads, seq_len, dim = 2, 4, 8, 32
    max_pos = 128

    # x is only used for its dtype (matches the PyTorch forward signature).
    x = jax.random.normal(key, (batch, num_heads, seq_len, dim),
                          dtype=jnp.float32)

    rope = AdapterRotaryEmbedding(dim, max_position_embeddings=max_pos,
                                  base=10000, dtype=x.dtype)
    cos, sin = rope(x, seq_len=seq_len)
    cos = jax.block_until_ready(cos)
    sin = jax.block_until_ready(sin)

    assert cos.shape == (seq_len, dim) and sin.shape == (seq_len, dim)
    assert cos.dtype == x.dtype and sin.dtype == x.dtype

    cos_ref, sin_ref = _reference(dim, max_pos, seq_len)
    assert jnp.allclose(cos, cos_ref, atol=1e-5, rtol=1e-5)
    assert jnp.allclose(sin, sin_ref, atol=1e-5, rtol=1e-5)

    # Full-cache check (lane-dense packed path, dim=32 < 128, pack=4).
    cos_f, sin_f = rope(x, seq_len=max_pos)
    cos_rf, sin_rf = _reference(dim, max_pos, max_pos)
    assert jnp.allclose(jax.block_until_ready(cos_f), cos_rf, atol=3e-4)
    assert jnp.allclose(jax.block_until_ready(sin_f), sin_rf, atol=3e-4)

    # Half-width-EUP path (dim % 256 == 0 -> duplicate via two direct stores).
    cos_h, sin_h = build_rope_cache(256, 512)
    cos_hr, sin_hr = _reference(256, 512, 512)
    assert jnp.allclose(jax.block_until_ready(cos_h), cos_hr, atol=3e-4)
    assert jnp.allclose(jax.block_until_ready(sin_h), sin_hr, atol=3e-4)

    # Awkward dim that does not divide 128 (dim=80 -> lcm packing, pack=8).
    cos_p, sin_p = build_rope_cache(80, 64)
    cos_pr, sin_pr = _reference(80, 64, 64)
    assert cos_p.shape == (64, 80)
    assert jnp.allclose(jax.block_until_ready(cos_p), cos_pr, atol=3e-4)
    assert jnp.allclose(jax.block_until_ready(sin_p), sin_pr, atol=3e-4)

    print("KERNEL_OK")
</pallas_src>

<mosaic_0001>
module attributes {stable_mosaic.version = 11 : i64} {
  func.func @_rope_cache_kernel(%arg0: i32, %arg1: memref<2x128xf32, #tpu.memory_space<vmem>>, %arg2: memref<16x128xf32, #tpu.memory_space<vmem>>, %arg3: memref<16x128xf32, #tpu.memory_space<vmem>>) attributes {dimension_semantics = [#tpu.dimension_semantics<parallel>], iteration_bounds = array<i64: 2>, scalar_prefetch = 0 : i64, scratch_operands = 0 : i64, tpu.core_type = #tpu.core_type<tc>, window_params = [{pipeline_mode = #tpu.pipeline_mode<synchronous>, transform_indices = @transform_0, window_bounds = array<i64: 2, 128>}, {transform_indices = @transform_1, window_bounds = array<i64: 16, 128>}, {transform_indices = @transform_2, window_bounds = array<i64: 16, 128>}]} {
    %c0 = arith.constant 0 : index
    %c0_0 = arith.constant 0 : index
    %0 = vector.load %arg1[%c0, %c0_0] : memref<2x128xf32, #tpu.memory_space<vmem>>, vector<1x128xf32>
    %1 = tpu.iota {dimensions = array<i32: 0>} : vector<16x128xi32>
    %c16_i32 = arith.constant 16 : i32
    %2 = arith.muli %arg0, %c16_i32 : i32
    %3 = vector.broadcast %2 : i32 to vector<16x128xi32>
    %4 = arith.addi %1, %3 : vector<16x128xi32>
    %c4_i32 = arith.constant 4 : i32
    %5 = vector.broadcast %c4_i32 : i32 to vector<16x128xi32>
    %6 = arith.muli %4, %5 : vector<16x128xi32>
    %7 = arith.sitofp %6 : vector<16x128xi32> to vector<16x128xf32>
    %c1 = arith.constant 1 : index
    %c0_1 = arith.constant 0 : index
    %8 = vector.load %arg1[%c1, %c0_1] : memref<2x128xf32, #tpu.memory_space<vmem>>, vector<1x128xf32>
    %9 = vector.broadcast %8 : vector<1x128xf32> to vector<16x128xf32>
    %10 = arith.addf %7, %9 : vector<16x128xf32>
    %11 = vector.broadcast %0 : vector<1x128xf32> to vector<16x128xf32>
    %12 = arith.mulf %10, %11 : vector<16x128xf32>
    %13 = math.cos %12 : vector<16x128xf32>
    %c0_2 = arith.constant 0 : index
    %c0_3 = arith.constant 0 : index
    %14 = vector.load %arg2[%c0_2, %c0_3] : memref<16x128xf32, #tpu.memory_space<vmem>>, vector<16x128xf32>
    tpu.vector_store %arg2[%c0_2, %c0_3], %13 {strides = array<i32>} : memref<16x128xf32, #tpu.memory_space<vmem>>, vector<16x128xf32>,
    %15 = math.sin %12 : vector<16x128xf32>
    %c0_4 = arith.constant 0 : index
    %c0_5 = arith.constant 0 : index
    %16 = vector.load %arg3[%c0_4, %c0_5] : memref<16x128xf32, #tpu.memory_space<vmem>>, vector<16x128xf32>
    tpu.vector_store %arg3[%c0_4, %c0_5], %15 {strides = array<i32>} : memref<16x128xf32, #tpu.memory_space<vmem>>, vector<16x128xf32>,
    return
  }
  func.func @transform_0(%arg0: i32) -> (i32, i32) {
    %c0_i32 = arith.constant 0 : i32
    %c0_i32_0 = arith.constant 0 : i32
    %c0_i32_1 = arith.constant 0 : i32
    return %c0_i32, %c0_i32_0 : i32, i32
  }
  func.func @transform_1(%arg0: i32) -> (i32, i32) {
    %c0_i32 = arith.constant 0 : i32
    %c0_i32_0 = arith.constant 0 : i32
    return %arg0, %c0_i32 : i32, i32
  }
  func.func @transform_2(%arg0: i32) -> (i32, i32) {
    %c0_i32 = arith.constant 0 : i32
    %c0_i32_0 = arith.constant 0 : i32
    return %arg0, %c0_i32 : i32, i32
  }
}

</mosaic_0001>

<bundles_post_ra>
// kernel: tpu_custom_call.1
= control target key start
LH: loop header
LB: loop body
LE: loop exit
PB: predicated region body
PF: predicated region fallthrough
CT: control target
= control target key end

     0   :  { %8 = vsyncpa [#allocation3], 0  ;;  %s1241_s0 = inlined_call_operand.hbm [shape: f32[2,128], index: 0, kind: input, shape index: {}]   ;;  %s1242_s1 = inlined_call_operand.hbm [shape: f32[32,128], index: 1, kind: output, shape index: {0}]   ;;  %s1243_s2 = inlined_call_operand.hbm [shape: f32[32,128], index: 2, kind: output, shape index: {1}]  }
   0x1   :  { %9 = vsyncpa [#allocation4], 0 }
   0x2   :  { %11 = vsyncpa [#allocation4 + $0x1], 0 }
   0x3   :  { %12 = vsyncpa [#allocation7], 0 }
   0x4   :  { %14 = vsyncpa [#allocation7 + $0x1], 0  ;;  %s989_s9 = smov 0   ;;  %s991_s10 = smov 0  }
   0x5   :  { %s993_s11 = smov 0   ;;  %s995_s12 = smov 0  }
   0x6 LB: > { %s1010_s13 = sadd.s32 4294967295, %s961_s12   ;;  %s720_s14 = sadd.s32 4294967294, %s961_s12   ;;  %s961_s12 = sphi %s995_s12, %s1259_s12   ;;  %s957_s11 = sphi %s993_s11, %s1258_s11   ;;  %s953_s10 = sphi %s991_s10, %s1257_s10   ;;  %s949_s9 = sphi %s989_s9, %s1256_s9  }
   0x7   : > { %s1014_s15 = sadd.s32 1, %s961_s12   ;;  %s48_s16 = sadd.s32 1, %s957_s11 }
   0x8   : > { %s45_s17 = ssub.s32 %s961_s12, %s1014_s15  ;;  %p58_p0 = scmp.ne.s32.totalorder %s957_s11, %s953_s10 }
   0x9   : > { %p46_p1 = scmp.eq.s32.totalorder %s45_s17, 0  ;;  %p59_p2 = scmp.eq.s32.totalorder %s1010_s13, 1 }
   0xa   : > { %p64_p3 = scmp.ne.s32.totalorder %s953_s10, %s949_s9  ;;  %p65_p4 = scmp.eq.s32.totalorder %s720_s14, 1 }
   0xb   : > { %s1025_s18 = scalar_select %p46_p1, %s957_s11, %s48_s16  }
   0xc   : > { %p1027_p5 = por %p59_p2, %p58_p0  ;;  %p1031_p6 = por %p65_p4, %p64_p3 }
   0xd   : > { %p721_p7 = scmp.ge.s32.totalorder %s961_s12, 1  ;;  %p98_p8 = scmp.lt.s32.totalorder %s961_s12, 3 }
   0xe   : > { %s1247_s19 = scalar_select %p1027_p5, 1, 0 }
   0xf   : > { %s1248_s20 = scalar_select %p1031_p6, 1, 0 }
  0x10   : > { %p1244_p9 = scmp.eq.s32.totalorder %s1010_s13, 0  ;;  %p1038_p10 = pnand %p721_p7, %p98_p8 }
  0x11   : > { %s963_s22 = smov [#allocation2]   ;;  %s835_s27 = scalar_lea.hbm %s1241_s0, 32 }
  0x12   : > { %s1249_s21 = scalar_select %p1038_p10, 1, 0 }
  0x13   : > { %s111_s23 = sshll.u32 %s963_s22, 4  ;;  %p772_p11 = pneg %p1038_p10  ;;  %s112_s23 = int_to_ptr.vmem [resolvable:$true] %s111_s23 }
  0x14   : > { %p836_p13 = scmp.ne.s32.totalorder %s1241_s0, %s835_s27  ;;  %p842_p3 = scmp.lt.u32.totalorder %s835_s27, %s1241_s0 }
  0x15   : > { %p1046_p12 = pnand %p1244_p9, %p772_p11 }
  0x17   : > { %p837_p0 = pneg %p1046_p12 }
  0x19   : > { %p838_p1 = pnand %p837_p0, %p836_p13 }
  0x1b   : > { %p839_p2 = pneg %p838_p1 }
  0x1d   : > { %p844_p4 = pnand %p842_p3, %p839_p2 }
  0x1f   : > { %847 = shalt.err (!%p844_p4)
}
  0x20   : > { %s848_s4 = scalar_lea.vmem %s112_s23, 32  ;;  %p856_p9 = scmp.lt.s32.totalorder %s112_s23, %s112_s23 }
  0x21   : > { %p849_p7 = scmp.ne.s32.totalorder %s112_s23, %s848_s4  ;;  %p857_p6 = scmp.lt.s32.totalorder %s848_s4, %s848_s4 }
  0x23   : > { %p851_p8 = pnand %p849_p7, %p837_p0  ;;  %p858_p5 = por %p857_p6, %p856_p9 }
  0x25   : > { %p852_p11 = pneg %p851_p8 }
  0x27   : > { %p859_p10 = pnand %p858_p5, %p852_p11 }
  0x29   : > { %862 = shalt.err (!%p859_p10)
}
  0x2a   : > { %775 = dma.hbm_to_vmem [thread:$0]  (!%p1046_p12), %s1241_s0, 32, %s112_s23, [#allocation3]  }
  0x2b   : > { %p1251_p13 = scmp.ne.s32.totalorder %s1249_s21, 0 }
  0x2c   : > { %p1252_p1 = scmp.eq.s32.totalorder (!%p1251_p13), %s1010_s13, 0 }
  0x2d   : > { %124 = sbr.rel (%p1251_p13) target bundleno = 195 (0xc3), region = 24 }
  0x34   : > { %936 = dma.done.wait (%p1252_p1), [#allocation3], 32   ;;  %p1253_p0 = pmov %p1252_p1 }
  0x35   : > { %v149_v0 = vlaneseq  ;;  %s727_s7 = sshll.u32 %s1010_s13, 4  ;;  %v728_v7 = vld [vmem:[#allocation2 + $0x1] ss:$0 sm:$0xff]  ;;  %v729_v10 = vld [vmem:[#allocation2] ss:$0 sm:$0xff]  ;;  %s1139_s8 = sand.u32 1, %s953_s10  }
  0x36   : > { %938 = vsyncadd (%p1253_p0), [#allocation3], 4294967264  ;;  %v153_v1 = vstv %s727_s7  ;;  %v964_v35 = vmov 683565275   ;;  %v965_v37 = vmov 2475754826  }
  0x37   : > { %v150_v2 = vshrl.u32 %v149_v0, 7  ;;  %v966_v39 = vmov 2131351028   ;;  %v967_v41 = vmov 2102212464   ;;  %s725_s14 = sshll.u32 %s1139_s8, 4 }
  0x38   : > { %v968_v43 = vmov 920167782   ;;  %v969_v50 = vmov 1326507024   ;;  %s1144_s16 = scalar_lea.vmem [#allocation5], %s725_s14  ;;  %s1147_s17 = scalar_lea.vmem [#allocation6], %s725_s14 }
  0x39   : > { %v154_v3 = vadd.s32 %v153_v1, %v150_v2  ;;  %v151_v4 = vadd.s32 8, %v150_v2  ;;  %s610_s21 = sshll.u32 %s1144_s16, 4  ;;  %s754_s22 = sshll.u32 %s1010_s13, 8  ;;  %s1154_s21 = int_to_ptr.vmem [resolvable:$true] %s610_s21 }
  0x3a   : > { %s626_s23 = sshll.u32 %s1147_s17, 4  ;;  %s1159_s25 = scalar_lea.hbm %s1242_s1, %s754_s22  ;;  %s1161_s23 = int_to_ptr.vmem [resolvable:$true] %s626_s23 }
  0x3b   : > { %v156_v5 = vmul.u32 4, %v154_v3  ;;  %v155_v6 = vadd.s32 %v153_v1, %v151_v4  ;;  %s1166_s28 = scalar_lea.hbm %s1243_s2, %s754_s22  ;;  %s592_s29 = scalar_lea.sflag [#allocation4], %s1139_s8 }
  0x3c   : > { %s863_s30 = scalar_lea.vmem %s1154_s21, 256  ;;  %p1254_p6 = scmp.ne.s32.totalorder %s1247_s19, 0 }
  0x3d   : > { %v158_v8 = vcvt.s32.f32 %v156_v5  ;;  %v157_v9 = vmul.u32 4, %v155_v6  ;;  %p864_p5 = scmp.ne.s32.totalorder %s1154_s21, %s863_s30  ;;  %s970_s3 = smov [#allocation5]  }
  0x3e   : > { %s867_s4 = sshll.u32 %s970_s3, 4  ;;  %s868_s4 = int_to_ptr.vmem [resolvable:$false] %s867_s4 }
  0x3f   : > { %v165_v11 = vadd.f32 %v728_v7, %v158_v8  ;;  %v159_v12 = vcvt.s32.f32 %v157_v9  ;;  %p865_p9 = pnand %p864_p5, %p1254_p6  ;;  %s869_s5 = scalar_lea.vmem %s868_s4, 512 }
  0x40   : > { %p870_p12 = scmp.lt.s32.totalorder %s1154_s21, %s868_s4  ;;  %p871_p2 = scmp.lt.s32.totalorder %s869_s5, %s863_s30 }
  0x41   : > { %v1073_v13 = vmul.f32 %v729_v10, %v165_v11  ;;  %v166_v14 = vadd.f32 %v728_v7, %v159_v12  ;;  %p866_p10 = pneg %p865_p9 }
  0x42   : > { %p872_p3 = por %p871_p2, %p870_p12 }
  0x43   : > { %v173_v15 = vand.u32 2147483647, %v1073_v13  ;;  %v176_v16 = vand.u32 2139095040, %v1073_v13  ;;  %v1077_v17 = vmul.f32 %v729_v10, %v166_v14  ;;  %vm175_vm14 = vcmp.lt.s32.totalorder %v1073_v13, 0 }
  0x44   : > { %p873_p4 = pnand %p872_p3, %p866_p10 }
  0x45   : > { %v177_v18 = vshrl.u32 %v176_v16, 23  ;;  %v180_v19 = vand.u32 8388607, %v173_v15  ;;  %v276_v20 = vand.u32 2147483647, %v1077_v17  ;;  %v279_v21 = vand.u32 2139095040, %v1077_v17 }
  0x46   : > { %vm174_vm15 = vcmp.le.f32.partialorder %v173_v15, 0.7853982 }
  0x47   : > { %v730_v22 = vadd.s32 4294967169, %v177_v18  ;;  %v280_v23 = vshrl.u32 %v279_v21, 23  ;;  %v181_v25 = vor.u32 8388608, %v180_v19  ;;  %v1085_v27 = vand.u32 8388607, %v276_v20 }
  0x49   : > { %v183_v24 = vadd.s32 1, %v730_v22  ;;  %v734_v26 = vadd.s32 4294967169, %v280_v23  ;;  %v1087_v32 = vshll.u32 %v181_v25, 8  ;;  %v284_v33 = vor.u32 8388608, %v1085_v27 }
  0x4b   : > { %vm184_vm0 = vcmp.gt.s32.totalorder %v183_v24, 0  ;;  %v286_v29 = vadd.s32 1, %v734_v26 }
  0x4c   : > { %v185_v28 = vsel %vm184_vm0, %v183_v24, 0  ;;  %vm278_vm0 = vcmp.lt.s32.totalorder %v1077_v17, 0 }
  0x4d   : > { %v186_v30 = vshrl.u32 %v185_v28, 5  ;;  %v187_v31 = vand.u32 31, %v185_v28  ;;  %vm287_vm1 = vcmp.gt.s32.totalorder %v286_v29, 0 }
  0x4e   : > { %v288_v55 = vsel %vm287_vm1, %v286_v29, 0  ;;  %vm277_vm1 = vcmp.le.f32.partialorder %v276_v20, 0.7853982 }
  0x4f   : > { %v188_v34 = vsub.s32 32, %v187_v31  ;;  %v190_v36 = vshll.u32 %v964_v35, %v187_v31  ;;  %v193_v38 = vshll.u32 %v965_v37, %v187_v31  ;;  %v196_v40 = vshll.u32 %v966_v39, %v187_v31 }
  0x50   : > { %v199_v42 = vshll.u32 %v967_v41, %v187_v31  ;;  %v202_v44 = vshll.u32 %v968_v43, %v187_v31  ;;  %vm205_vm2 = vcmp.lt.s32.totalorder %v186_v30, 1  ;;  %vm206_vm3 = vcmp.lt.s32.totalorder %v186_v30, 2 }
  0x51   : > { %v189_v45 = vshrl.u32 %v964_v35, %v188_v34  ;;  %v191_v46 = vshrl.u32 %v965_v37, %v188_v34  ;;  %v194_v47 = vshrl.u32 %v966_v39, %v188_v34  ;;  %v197_v48 = vshrl.u32 %v967_v41, %v188_v34 }
  0x52   : > { %v200_v49 = vshrl.u32 %v968_v43, %v188_v34  ;;  %v203_v51 = vshrl.u32 %v969_v50, %v188_v34  ;;  %vm207_vm4 = vcmp.lt.s32.totalorder %v186_v30, 3  ;;  %vm208_vm5 = vcmp.lt.s32.totalorder %v186_v30, 4 }
  0x53   : > { %v192_v52 = vor.u32 %v191_v46, %v190_v36  ;;  %v195_v53 = vor.u32 %v194_v47, %v193_v38  ;;  %v198_v54 = vor.u32 %v197_v48, %v196_v40  ;;  %v289_v58 = vshrl.u32 %v288_v55, 5 }
  0x54   : > { %v201_v56 = vor.u32 %v200_v49, %v199_v42  ;;  %v204_v57 = vor.u32 %v203_v51, %v202_v44  ;;  %v290_v59 = vand.u32 31, %v288_v55 }
  0x55   : > { %v209_v60 = vsel %vm205_vm2, %v189_v45, %v192_v52  ;;  %v210_v61 = vsel %vm208_vm5, %v198_v54, 2102212464  ;;  %v213_v62 = vsel %vm205_vm2, %v192_v52, %v195_v53  ;;  %v217_v63 = vsel %vm205_vm2, %v195_v53, %v198_v54 }
  0x56   : > { %v211_v0 = vsel %vm207_vm4, %v195_v53, %v210_v61  ;;  %v214_v1 = vsel %vm208_vm5, %v201_v56, 920167782  ;;  %v218_v2 = vsel %vm208_vm5, %v204_v57, 1326507024  ;;  %v291_v3 = vsub.s32 32, %v290_v59 }
  0x57   : > { %v212_v4 = vsel %vm206_vm3, %v209_v60, %v211_v0  ;;  %v215_v5 = vsel %vm207_vm4, %v198_v54, %v214_v1  ;;  %v219_v6 = vsel %vm207_vm4, %v201_v56, %v218_v2  ;;  %v293_v7 = vshll.u32 %v964_v35, %v290_v59 }
  0x58   : > { %v216_v8 = vsel %vm206_vm3, %v213_v62, %v215_v5  ;;  %v220_v9 = vsel %vm206_vm3, %v217_v63, %v219_v6  ;;  %v228_v10 = vmul.u32 %v1087_v32, %v212_v4  ;;  %v292_v11 = vshrl.u32 %v964_v35, %v291_v3 }
  0x59   : > { %v1102_v12 = vmul.u32.u64.low %v1087_v32, %v220_v9  ;;  %v1103_v14 = vmul.u32.u64.high %v1087_v32, %v220_v9, %v1102_v12  ;;  %v1106_v16 = vmul.u32.u64.low %v1087_v32, %v216_v8  ;;  %v1107_v18 = vmul.u32.u64.high %v1087_v32, %v216_v8, %v1106_v16 }
  0x5a   : > { %v294_v19 = vshrl.u32 %v965_v37, %v291_v3  ;;  %v296_v21 = vshll.u32 %v965_v37, %v290_v59  ;;  %v297_v22 = vshrl.u32 %v966_v39, %v291_v3  ;;  %v299_v23 = vshll.u32 %v966_v39, %v290_v59 }
  0x5b   : > { %v300_v24 = vshrl.u32 %v967_v41, %v291_v3  ;;  %v302_v25 = vshll.u32 %v967_v41, %v290_v59  ;;  %v303_v26 = vshrl.u32 %v968_v43, %v291_v3  ;;  %v305_v28 = vshll.u32 %v968_v43, %v290_v59 }
  0x5c   : > { %v295_v29 = vor.u32 %v294_v19, %v293_v7  ;;  %v298_v30 = vor.u32 %v297_v22, %v296_v21  ;;  %v306_v31 = vshrl.u32 %v969_v50, %v291_v3  ;;  %vm308_vm6 = vcmp.lt.s32.totalorder %v289_v58, 1 }
  0x5d   : > { %vm230_vm7 = vc.u32 %v1103_v14, %v1106_v16  ;;  %v231_v34 = vadd.s32 1, %v1107_v18  ;;  %v301_v35 = vor.u32 %v300_v24, %v299_v23  ;;  %v324_v32 = vshll.u32 %v284_v33, 8 }
  0x5e   : > { %v304_v36 = vor.u32 %v303_v26, %v302_v25  ;;  %v307_v37 = vor.u32 %v306_v31, %v305_v28  ;;  %vm309_vm8 = vcmp.lt.s32.totalorder %v289_v58, 2  ;;  %vm310_vm9 = vcmp.lt.s32.totalorder %v289_v58, 3 }
  0x5f   : > { %v232_v38 = vsel %vm230_vm7, %v231_v34, %v1107_v18  ;;  %vm311_vm10 = vcmp.lt.s32.totalorder %v289_v58, 4  ;;  %v312_v39 = vsel %vm308_vm6, %v292_v11, %v295_v29  ;;  %v316_v40 = vsel %vm308_vm6, %v295_v29, %v298_v30 }
  0x60   : > { %v233_v41 = vadd.s32 %v232_v38, %v228_v10  ;;  %v313_v42 = vsel %vm311_vm10, %v301_v35, 2102212464  ;;  %v317_v43 = vsel %vm311_vm10, %v304_v36, 920167782  ;;  %v320_v44 = vsel %vm308_vm6, %v298_v30, %v301_v35 }
  0x61   : > { %v314_v45 = vsel %vm310_vm9, %v298_v30, %v313_v42  ;;  %v318_v46 = vsel %vm310_vm9, %v301_v35, %v317_v43  ;;  %v321_v27 = vsel %vm311_vm10, %v307_v37, 1326507024  ;;  %v229_v5 = vadd.s32 %v1106_v16, %v1103_v14 }
  0x62   : > { %v234_v33 = vadd.s32 536870912, %v233_v41  ;;  %v319_v47 = vsel %vm309_vm8, %v316_v40, %v318_v46  ;;  %v322_v48 = vsel %vm310_vm9, %v304_v36, %v321_v27  ;;  %v315_v49 = vsel %vm309_vm8, %v312_v39, %v314_v45 }
  0x63   : > { %v323_v50 = vsel %vm309_vm8, %v320_v44, %v322_v48  ;;  %v1120_v51 = vmul.u32.u64.low %v324_v32, %v319_v47  ;;  %v1121_v52 = vmul.u32.u64.high %v324_v32, %v319_v47, %v1120_v51  ;;  %v331_v57 = vmul.u32 %v324_v32, %v315_v49 }
  0x64   : > { %v235_v53 = vshrl.u32 %v234_v33, 30  ;;  %v1123_v54 = vmul.u32.u64.low %v324_v32, %v323_v50  ;;  %v1124_v55 = vmul.u32.u64.high %v324_v32, %v323_v50, %v1123_v54  ;;  %vm265_vm8 = vweird.f32 %v1073_v13 }
  0x65   : > { %v334_v59 = vadd.s32 1, %v1121_v52 }
  0x66   : > { %v236_v56 = vshll.u32 %v235_v53, 30  ;;  %vm333_vm11 = vc.u32 %v1124_v55, %v1120_v51  ;;  %v259_v29 = vsub.s32 4, %v235_v53  ;;  %v332_v14 = vadd.s32 %v1120_v51, %v1124_v55 }
  0x67   : > { %v335_v61 = vsel %vm333_vm11, %v334_v59, %v1121_v52 }
  0x68   : > { %v237_v60 = vsub.s32 %v233_v41, %v236_v56  ;;  %v336_v63 = vadd.s32 %v335_v61, %v331_v57  ;;  %v260_v36 = vsel %vm175_vm14, %v259_v29, %v235_v53 }
  0x69   : > { %v262_v41 = vsel %vm174_vm15, 0, %v260_v36 }
  0x6a   : > { %v239_v62 = vsub.s32 0, %v237_v60  ;;  %v337_v0 = vadd.s32 536870912, %v336_v63  ;;  %v474_v46 = vadd.s32 3, %v262_v41  ;;  %v266_v15 = vand.u32 3, %v262_v41 }
  0x6c   : > { %v731_v58 = vmin.u32 %v239_v62, %v237_v60  ;;  %v338_v2 = vshrl.u32 %v337_v0, 30  ;;  %v475_v48 = vand.u32 3, %v474_v46  ;;  %vm271_vm2 = vcmp.eq.s32.totalorder %v266_v15, 2 }
  0x6d   : > { %vm268_vm4 = vcmp.eq.s32.totalorder %v266_v15, 0  ;;  %vm267_vm6 = vcmp.lt.s32.totalorder %v266_v15, 2 }
  0x6e   : > { %v241_v1 = vclz %v731_v58  ;;  %v339_v4 = vshll.u32 %v338_v2, 30  ;;  %v362_v33 = vsub.s32 4, %v338_v2  ;;  %vm480_vm3 = vcmp.eq.s32.totalorder %v475_v48, 2 }
  0x6f   : > { %vm477_vm5 = vcmp.eq.s32.totalorder %v475_v48, 0  ;;  %vm476_vm7 = vcmp.lt.s32.totalorder %v475_v48, 2 }
  0x70   : > { %v732_v3 = vadd.s32 4294967294, %v241_v1  ;;  %v340_v7 = vsub.s32 %v336_v63, %v339_v4  ;;  %v363_v50 = vsel %vm278_vm0, %v362_v33, %v338_v2 }
  0x71   : > { %v365_v54 = vsel %vm277_vm1, 0, %v363_v50 }
  0x72   : > { %vm733_vm12 = vcmp.lt.s32.totalorder %v732_v3, 0  ;;  %v342_v11 = vsub.s32 0, %v340_v7  ;;  %v369_v2 = vand.u32 3, %v365_v54 }
  0x73   : > { %v244_v6 = vsel %vm733_vm12, 0, %v732_v3 }
  0x74   : > { %v245_v8 = vsub.s32 32, %v244_v6  ;;  %v246_v9 = vshll.u32 %v237_v60, %v244_v6  ;;  %v249_v10 = vsub.s32 4294967266, %v244_v6  ;;  %v735_v19 = vmin.u32 %v342_v11, %v340_v7 }
  0x75   : > { %v578_v60 = vadd.s32 3, %v365_v54  ;;  %vm374_vm9 = vcmp.eq.s32.totalorder %v369_v2, 2  ;;  %vm371_vm11 = vcmp.eq.s32.totalorder %v369_v2, 0 }
  0x76   : > { %v247_v12 = vshrl.u32 %v229_v5, %v245_v8  ;;  %v250_v18 = vadd.s32 127, %v249_v10  ;;  %v344_v23 = vclz %v735_v19 }
  0x78   : > { %v248_v21 = vor.u32 %v247_v12, %v246_v9  ;;  %v251_v22 = vshll.u32 %v250_v18, 23  ;;  %v736_v26 = vadd.s32 4294967294, %v344_v23 }
  0x7a   : > { %v252_v24 = vor.u32 4788187, %v251_v22  ;;  %v255_v25 = vcvt.s32.f32 %v248_v21  ;;  %vm737_vm13 = vcmp.lt.s32.totalorder %v736_v26, 0 }
  0x7b   : > { %v347_v30 = vsel %vm737_vm13, 0, %v736_v26  ;;  %vm370_vm13 = vcmp.lt.s32.totalorder %v369_v2, 2 }
  0x7c   : > { %v253_v28 = vand.u32 2147483647, %v252_v24  ;;  %v348_v31 = vsub.s32 32, %v347_v30  ;;  %v349_v34 = vshll.u32 %v340_v7, %v347_v30  ;;  %v352_v35 = vsub.s32 4294967266, %v347_v30 }
  0x7e   : > { %v256_v16 = vmul.f32 %v255_v25, %v253_v28  ;;  %v350_v37 = vshrl.u32 %v332_v14, %v348_v31  ;;  %v353_v38 = vadd.s32 127, %v352_v35 }
  0x80   : > { %v257_v32 = vxor.u32 2147483648, %v256_v16  ;;  %v351_v42 = vor.u32 %v350_v37, %v349_v34  ;;  %v354_v43 = vshll.u32 %v353_v38, 23 }
  0x82   : > { %v258_v39 = vsel %vm175_vm14, %v257_v32, %v256_v16  ;;  %v355_v44 = vor.u32 4788187, %v354_v43  ;;  %v358_v45 = vcvt.s32.f32 %v351_v42 }
  0x83   : > { %v261_v40 = vsel %vm174_vm15, %v1073_v13, %v258_v39  ;;  %v579_v13 = vand.u32 3, %v578_v60  ;;  %vm368_vm15 = vweird.f32 %v1077_v17 }
  0x84   : > { %827 = vcosq.f32 %v261_v40  ;;  %v356_v27 = vand.u32 2147483647, %v355_v44 }
  0x85   : > { %829 = vsinq.f32 %v261_v40  ;;  %vm584_vm10 = vcmp.eq.s32.totalorder %v579_v13, 2  ;;  %vm581_vm12 = vcmp.eq.s32.totalorder %v579_v13, 0  ;;  %vm580_vm14 = vcmp.lt.s32.totalorder %v579_v13, 2 }
  0x86   : > { %v359_v47 = vmul.f32 %v358_v45, %v356_v27 }
  0x88   : > { %v360_v49 = vxor.u32 2147483648, %v359_v47 }
  0x8a   : > { %v361_v51 = vsel %vm278_vm0, %v360_v49, %v359_v47 }
  0x8b   : > { %v364_v53 = vsel %vm277_vm1, %v1077_v17, %v361_v51 }
  0x8c   : > { %831 = vcosq.f32 %v364_v53 }
  0x8d   : > { %833 = vsinq.f32 %v364_v53 }
  0x8e   : > { %v828_v52 = vpop.eup %827 }
  0x8f   : > { %v830_v55 = vpop.eup %829  ;;  %v272_v56 = vxor.u32 2147483648, %v828_v52 }
  0x90   : > { %v269_v20 = vxor.u32 2147483648, %v830_v55 }
  0x91   : > { %v273_v57 = vsel %vm271_vm2, %v272_v56, %v830_v55  ;;  %v482_v59 = vsel %vm480_vm3, %v272_v56, %v830_v55 }
  0x92   : > { %v270_v61 = vsel %vm268_vm4, %v828_v52, %v269_v20  ;;  %v479_v62 = vsel %vm477_vm5, %v828_v52, %v269_v20 }
  0x93   : > { %v274_v63 = vsel %vm267_vm6, %v270_v61, %v273_v57  ;;  %v483_v58 = vsel %vm476_vm7, %v479_v62, %v482_v59 }
  0x94   : > { %v275_v0 = vsel %vm265_vm8, nan, %v274_v63  ;;  %v484_v1 = vsel %vm265_vm8, nan, %v483_v58 }
  0x95   : > { %379 = vst [vmem:[%s1144_s16] sm:$0xff] %v275_v0  ;;  %589 = vst [vmem:[%s1147_s17] sm:$0xff] %v484_v1 }
  0x96   : > { %v832_v3 = vpop.eup %831 }
  0x97   : > { %v834_v4 = vpop.eup %833  ;;  %v375_v5 = vxor.u32 2147483648, %v832_v3 }
  0x98   : > { %v372_v6 = vxor.u32 2147483648, %v834_v4 }
  0x99   : > { %v376_v7 = vsel %vm374_vm9, %v375_v5, %v834_v4  ;;  %v586_v8 = vsel %vm584_vm10, %v375_v5, %v834_v4 }
  0x9a   : > { %v373_v9 = vsel %vm371_vm11, %v832_v3, %v372_v6  ;;  %v583_v10 = vsel %vm581_vm12, %v832_v3, %v372_v6 }
  0x9b   : > { %v377_v11 = vsel %vm370_vm13, %v373_v9, %v376_v7  ;;  %v587_v12 = vsel %vm580_vm14, %v583_v10, %v586_v8 }
  0x9c   : > { %v378_v17 = vsel %vm368_vm15, nan, %v377_v11  ;;  %v588_v18 = vsel %vm368_vm15, nan, %v587_v12 }
  0x9d   : > { %380 = vst [vmem:[%s1144_s16 + $0x8] sm:$0xff] %v378_v17  ;;  %590 = vst [vmem:[%s1147_s17 + $0x8] sm:$0xff] %v588_v18 }
  0x9e   : > { %876 = shalt.err (!%p873_p4)
}
  0x9f   : > { %s877_s6 = scalar_lea.hbm %s1159_s25, 256  ;;  %s881_s16 = scalar_lea.hbm %s1242_s1, 512 }
  0xa0   : > { %p878_p7 = scmp.ne.s32.totalorder %s1159_s25, %s877_s6  ;;  %p882_p13 = scmp.lt.u32.totalorder %s1159_s25, %s1242_s1 }
  0xa1   : > { %p883_p1 = scmp.lt.u32.totalorder %s881_s16, %s877_s6  ;;  %p885_p5 = scmp.lt.u32.totalorder %s877_s6, %s1159_s25 }
  0xa2   : > { %p879_p8 = pnand %p878_p7, %p1254_p6 }
  0xa3   : > { %p884_p0 = por %p883_p1, %p882_p13 }
  0xa4   : > { %p880_p11 = pneg %p879_p8 }
  0xa5   : > { %p886_p9 = por %p885_p5, %p884_p0 }
  0xa7   : > { %p887_p10 = pnand %p886_p9, %p880_p11 }
  0xa9   : > { %890 = shalt.err (!%p887_p10)
}
  0xaa   : > { %s971_s24 = smov 128   ;;  %s972_s13 = smov 8  }
  0xab   : > { %768 = dma.vmem_to_hbm [thread:$0]  (%p1254_p6), %s1154_s21, 256, %s1159_s25, %s592_s29, %s971_s24, %s971_s24, %s972_s13  }
  0xac   : > { %s597_s26 = scalar_lea.sflag [#allocation7], %s1139_s8  ;;  %s891_s27 = scalar_lea.vmem %s1161_s23, 256 }
  0xad   : > { %p892_p12 = scmp.ne.s32.totalorder %s1161_s23, %s891_s27  ;;  %s973_s30 = smov [#allocation6]  }
  0xae   : > { %s895_s3 = sshll.u32 %s973_s30, 4  ;;  %s896_s3 = int_to_ptr.vmem [resolvable:$false] %s895_s3 }
  0xaf   : > { %p893_p2 = pnand %p892_p12, %p1254_p6  ;;  %s897_s4 = scalar_lea.vmem %s896_s3, 512 }
  0xb0   : > { %p898_p4 = scmp.lt.s32.totalorder %s1161_s23, %s896_s3  ;;  %p899_p7 = scmp.lt.s32.totalorder %s897_s4, %s891_s27 }
  0xb1   : > { %p894_p3 = pneg %p893_p2 }
  0xb2   : > { %p900_p8 = por %p899_p7, %p898_p4 }
  0xb4   : > { %p901_p11 = pnand %p900_p8, %p894_p3 }
  0xb6   : > { %904 = shalt.err (!%p901_p11)
}
  0xb7   : > { %s905_s21 = scalar_lea.hbm %s1166_s28, 256  ;;  %s909_s5 = scalar_lea.hbm %s1243_s2, 512 }
  0xb8   : > { %p906_p13 = scmp.ne.s32.totalorder %s1166_s28, %s905_s21  ;;  %p910_p5 = scmp.lt.u32.totalorder %s1166_s28, %s1243_s2 }
  0xb9   : > { %p911_p9 = scmp.lt.u32.totalorder %s909_s5, %s905_s21  ;;  %p913_p12 = scmp.lt.u32.totalorder %s905_s21, %s1166_s28 }
  0xba   : > { %p907_p1 = pnand %p906_p13, %p1254_p6 }
  0xbb   : > { %p912_p10 = por %p911_p9, %p910_p5 }
  0xbc   : > { %p908_p0 = pneg %p907_p1 }
  0xbd   : > { %p914_p2 = por %p913_p12, %p912_p10 }
  0xbf   : > { %p915_p3 = pnand %p914_p2, %p908_p0 }
  0xc1   : > { %918 = shalt.err (!%p915_p3)
}
  0xc2   : > { %769 = dma.vmem_to_hbm [thread:$0]  (%p1254_p6), %s1161_s23, 256, %s1166_s28, %s597_s26, %s971_s24, %s971_s24, %s972_s13  }
  0xc3 PF: > { %p785_p4 = scmp.ge.s32.totalorder %s961_s12, 2  ;;  %s641_s14 = sand.u32 1, %s949_s9  }
  0xc4   : > { %p1255_p7 = scmp.ne.s32.totalorder %s1248_s20, 0  ;;  %s642_s16 = scalar_lea.sflag [#allocation4], %s641_s14 }
  0xc6   : > { %p777_p8 = pnand %p785_p4, %p1255_p7 }
  0xc8   : > { %940 = dma.done.wait (!%p777_p8), %s642_s16, 256  }
  0xc9   : > { %942 = vsyncadd (!%p777_p8), %s642_s16, 4294967040  ;;  %s651_s19 = scalar_lea.sflag [#allocation7], %s641_s14 }
  0xca   : > { %944 = dma.done.wait (!%p777_p8), %s651_s19, 256  }
  0xcb   : > { %946 = vsyncadd (!%p777_p8), %s651_s19, 4294967040  ;;  %p17_p6 = scmp.ge.s32.totalorder %s1014_s15, 4   ;;  %s1256_s9 = smov %s953_s10 }
  0xcc   : > { %s1257_s10 = smov %s957_s11  ;;  %s1258_s11 = smov %s1025_s18 }
  0xcd   : > { %s1259_s12 = smov %s1014_s15  ;;  %19 = sbr.rel (!%p17_p6) target bundleno = 6 (0x6), region = 78 }
  0xd4   :  { %656 = vsyncpa [#allocation3], 1 }
  0xd5   :  { %658 = vsyncpa [#allocation3 + $0x1], 1 }
  0xd6   :  { %659 = vsyncpa [#allocation4], 1 }
  0xd7   :  { %661 = vsyncpa [#allocation4 + $0x1], 1 }
  0xd8   :  { %662 = vsyncpa [#allocation7], 1 }
  0xd9   :  { %664 = vsyncpa [#allocation7 + $0x1], 1 }

</bundles_post_ra>
